<compile_context>
chip_gen: v5e
topology: v5e:2x2
jax: 0.10.0
libtpu: 0.0.40
codegen_flags: <defaults>
</compile_context>

<pallas_src>
from typing import List, Optional

import jax
import jax.numpy as jnp
from jax import lax
from jax.experimental import pallas as pl
from jax.experimental.pallas import tpu as pltpu

_LANE = 128
_SUBLANE = 8
_VMEM_TM_BUDGET = 40 << 20    # shrink the row tile if the working set exceeds this
_VMEM_LIMIT_CAP = 48 << 20    # never request more scoped VMEM than this


def _round_up(x: int, m: int) -> int:
    return ((x + m - 1) // m) * m


def _make_kernel(num_encoders: int, has_mask: bool, k_offsets, k_sizes):
    """Kernel closure for a fixed encoder count / fused-table K layout."""

    def kernel(*refs):
        # refs: ids (tm, N) i32, [mask (tm, 1) f32], fused_table (K, D_cols),
        #       out (tm, D_cols)
        ids_ref = refs[0]
        idx = 1
        mask_ref = None
        if has_mask:
            mask_ref = refs[idx]
            idx += 1
        table_ref = refs[idx]
        out_ref = refs[idx + 1]

        tm, d_cols = out_ref.shape
        ids_all = ids_ref[...]                                   # (tm, N), one load

        # Per-encoder one-hot gather against only that encoder's K-slice of the
        # block-diagonal table.  Summing the partial dots realizes the concat
        # because each K-slice only has nonzeros in its own D columns.
        enc = jnp.zeros((tm, d_cols), jnp.float32)
        for e in range(num_encoders):
            k0, ke = k_offsets[e], k_sizes[e]
            ids_col = lax.slice_in_dim(ids_all, e, e + 1, axis=1)        # (tm, 1)
            iota = lax.broadcasted_iota(jnp.int32, (tm, ke), 1)
            hot = (ids_col == iota).astype(table_ref.dtype)              # (tm, ke)
            enc = enc + jnp.dot(
                hot, table_ref[k0:k0 + ke, :],
                preferred_element_type=jnp.float32,
                precision=lax.Precision.HIGHEST)
        if has_mask:
            enc = enc * mask_ref[...]                     # (tm, 1) lane-broadcast
        out_ref[...] = enc.astype(out_ref.dtype)          # single lane-dense store

    return kernel


def multi_arbitrary_positional_encoder(
    positional_ids: List[jax.Array],
    tables: List[jax.Array],
    attention_mask: Optional[jax.Array] = None,
    *,
    row_tile: int = 512,
) -> jax.Array:
    """Pallas-backed forward pass.

    positional_ids: list of (B, S) integer arrays (ids in [0, L_i))
    tables:         list of (L_i, D_i) embedding tables
    attention_mask: optional (B, S) array (multiplied into every feature)
    returns:        (B, S, sum(D_i))
    """
    num_enc = len(positional_ids)
    assert num_enc == len(tables) and num_enc >= 1
    B, S = positional_ids[0].shape
    M = B * S

    out_dtype = jnp.result_type(*tables)          # bf16 tables stay bf16 (no upcast)
    itemsize = jnp.dtype(out_dtype).itemsize

    Ds = [int(t.shape[1]) for t in tables]
    D_total = sum(Ds)
    # Lane-dense output: pad the feature axis only when it is not already a
    # multiple of 128 (avoids the post-kernel column-slice copy otherwise).
    D_cols = D_total if D_total % _LANE == 0 else _round_up(D_total, _LANE)

    # Block-diagonal fused table built from padded blocks + one concatenate
    # (no repeated full-table .at[].set() copies).
    blocks, k_offsets, k_sizes = [], [], []
    k_off = d_off = 0
    for t in tables:
        L, D = int(t.shape[0]), int(t.shape[1])
        Lp = _round_up(L, _SUBLANE)
        blocks.append(jnp.pad(t.astype(out_dtype),
                              ((0, Lp - L), (d_off, D_cols - d_off - D))))
        k_offsets.append(k_off)
        k_sizes.append(Lp)
        k_off += Lp
        d_off += D
    fused_table = blocks[0] if len(blocks) == 1 else jnp.concatenate(blocks, axis=0)
    K_total = k_off

    has_mask = attention_mask is not None

    def working_set_bytes(tm: int) -> int:
        b = _round_up(K_total, _SUBLANE) * _round_up(D_cols, _LANE) * itemsize  # table (single-buffered)
        b += 2 * tm * _round_up(num_enc, _LANE) * 4                             # packed ids (double-buffered)
        if has_mask:
            b += 2 * tm * _LANE * 4                                             # mask (double-buffered)
        b += 2 * tm * _round_up(D_cols, _LANE) * 4                              # output (double-buffered)
        b += tm * _round_up(max(k_sizes), _LANE) * 4                            # hot intermediate
        b += tm * _round_up(D_cols, _LANE) * 4                                  # f32 accumulator
        return b

    # Row tile: biggest that fits the VMEM budget; keep >= 2 tiles when M allows
    # so the "parallel" row axis spans both TensorCores on v7x.
    tm = max(_SUBLANE, min(row_tile, _round_up(M, _SUBLANE)))
    if M >= 2 * _SUBLANE and _round_up(M, tm) // tm < 2:
        tm = max(_SUBLANE, _round_up((M + 1) // 2, _SUBLANE))
    while tm > _SUBLANE and working_set_bytes(tm) > _VMEM_TM_BUDGET:
        tm = max(_SUBLANE, _round_up(tm // 2, _SUBLANE))

    M_pad = _round_up(M, tm)
    n_tiles = M_pad // tm

    # All N id streams packed into ONE (M_pad, N) int32 array -> one DMA per step.
    ids2d = jnp.stack([p.reshape(M).astype(jnp.int32) for p in positional_ids], axis=1)
    if M_pad > M:
        ids2d = jnp.pad(ids2d, ((0, M_pad - M), (0, 0)))   # pad rows gather row 0; sliced off below

    inputs = [ids2d]
    in_specs = [pl.BlockSpec((tm, num_enc), lambda i: (i, 0))]

    if has_mask:
        m = attention_mask.reshape(M).astype(jnp.float32)
        if M_pad > M:
            m = jnp.pad(m, (0, M_pad - M))
        inputs.append(m.reshape(M_pad, 1))
        in_specs.append(pl.BlockSpec((tm, 1), lambda i: (i, 0)))

    inputs.append(fused_table)
    # Constant index_map -> fetched once; single-buffer it to halve its VMEM cost.
    in_specs.append(pl.BlockSpec((K_total, D_cols), lambda i: (0, 0),
                                 pipeline_mode=pl.Buffered(1)))

    vmem_limit = int(min(max(2 * working_set_bytes(tm) + (1 << 20), 16 << 20),
                         _VMEM_LIMIT_CAP))

    out = pl.pallas_call(
        _make_kernel(num_enc, has_mask, tuple(k_offsets), tuple(k_sizes)),
        out_shape=jax.ShapeDtypeStruct((M_pad, D_cols), out_dtype),
        grid_spec=pltpu.PrefetchScalarGridSpec(
            num_scalar_prefetch=0,
            grid=(n_tiles,),
            in_specs=in_specs,
            out_specs=pl.BlockSpec((tm, D_cols), lambda i: (i, 0)),
        ),
        compiler_params=pltpu.CompilerParams(
            dimension_semantics=("parallel",),
            vmem_limit_bytes=vmem_limit),
    )(*inputs)

    if M_pad > M:
        out = out[:M]
    if D_cols > D_total:
        out = out[:, :D_total]
    return out.reshape(B, S, D_total)


def _reference(positional_ids, tables, attention_mask):
    encs = [t[p] for p, t in zip(positional_ids, tables)]
    out = jnp.concatenate(encs, axis=-1)
    if attention_mask is not None:
        out = out * attention_mask[..., None].astype(out.dtype)
    return out


if __name__ == "__main__":
    key = jax.random.PRNGKey(0)

    # Module config: max_lengths=[16, 16], embedding_dims=[32, 32]
    B, S = 2, 8
    max_lengths = [16, 16]
    embedding_dims = [32, 32]

    keys = jax.random.split(key, 2 * len(max_lengths) + 1)

    # Deterministic "learned" embedding tables (nn.Embedding weights).
    tables = [
        jax.random.normal(keys[i], (L, D), dtype=jnp.float32)
        for i, (L, D) in enumerate(zip(max_lengths, embedding_dims))
    ]

    # Positional ids per encoder: (B, S) int32 in [0, max_len_i)
    positional_ids = [
        jax.random.randint(keys[len(max_lengths) + i], (B, S), 0, L, dtype=jnp.int32)
        for i, L in enumerate(max_lengths)
    ]

    # Attention mask (B, S) of 0/1 floats.
    attention_mask = (
        jax.random.uniform(keys[-1], (B, S)) > 0.3
    ).astype(jnp.float32)

    # Masked path.
    out = multi_arbitrary_positional_encoder(positional_ids, tables, attention_mask)
    out = jax.block_until_ready(out)
    ref = _reference(positional_ids, tables, attention_mask)
    assert out.shape == (B, S, sum(embedding_dims)), out.shape
    assert jnp.allclose(out, ref, atol=1e-5, rtol=1e-5), "mismatch vs reference (masked)"

    # Mask-free path (separate compiled variant, no dummy mask stream).
    out_nm = multi_arbitrary_positional_encoder(positional_ids, tables, None)
    out_nm = jax.block_until_ready(out_nm)
    ref_nm = _reference(positional_ids, tables, None)
    assert jnp.allclose(out_nm, ref_nm, atol=1e-5, rtol=1e-5), "mismatch vs reference (no mask)"

    print("KERNEL_OK")
</pallas_src>

<mosaic_0001>
module attributes {stable_mosaic.version = 11 : i64} {
  func.func @kernel(%arg0: i32, %arg1: memref<8x2xi32, #tpu.memory_space<vmem>>, %arg2: memref<8x1xf32, #tpu.memory_space<vmem>>, %arg3: memref<32x128xf32, #tpu.memory_space<vmem>>, %arg4: memref<8x128xf32, #tpu.memory_space<vmem>>) attributes {dimension_semantics = [#tpu.dimension_semantics<parallel>], iteration_bounds = array<i64: 2>, scalar_prefetch = 0 : i64, scratch_operands = 0 : i64, tpu.core_type = #tpu.core_type<tc>, window_params = [{transform_indices = @transform_0, window_bounds = array<i64: 8, 2>}, {transform_indices = @transform_1, window_bounds = array<i64: 8, 1>}, {pipeline_mode = #tpu.pipeline_mode<synchronous>, transform_indices = @transform_2, window_bounds = array<i64: 32, 128>}, {transform_indices = @transform_3, window_bounds = array<i64: 8, 128>}]} {
    %c0 = arith.constant 0 : index
    %c0_0 = arith.constant 0 : index
    %0 = vector.load %arg1[%c0, %c0_0] : memref<8x2xi32, #tpu.memory_space<vmem>>, vector<8x2xi32>
    %cst = arith.constant 0.000000e+00 : f32
    %1 = vector.broadcast %cst : f32 to vector<8x128xf32>
    %2 = vector.extract_strided_slice %0 {offsets = [0, 0], sizes = [8, 1], strides = [1, 1]} : vector<8x2xi32> to vector<8x1xi32>
    %3 = tpu.iota {dimensions = array<i32: 1>} : vector<8x16xi32>
    %4 = vector.broadcast %2 : vector<8x1xi32> to vector<8x16xi32>
    %5 = arith.cmpi eq, %4, %3 : vector<8x16xi32>
    %6 = arith.extui %5 : vector<8x16xi1> to vector<8x16xi32>
    %7 = arith.sitofp %6 : vector<8x16xi32> to vector<8x16xf32>
    %c0_1 = arith.constant 0 : index
    %c0_2 = arith.constant 0 : index
    %8 = vector.load %arg3[%c0_1, %c0_2] : memref<32x128xf32, #tpu.memory_space<vmem>>, vector<16x128xf32>
    %cst_3 = arith.constant dense<0.000000e+00> : vector<8x128xf32>
    %9 = tpu.matmul %7, %8, %cst_3 {dimension_numbers = #tpu.dot_dimension_numbers<[1], [0], [0], [1], [0, 0, 1, 1], [], []>, precision = #tpu.contract_precision<fp32>} : vector<8x16xf32>, vector<16x128xf32>, vector<8x128xf32> -> vector<8x128xf32>
    %10 = arith.addf %1, %9 : vector<8x128xf32>
    %11 = vector.extract_strided_slice %0 {offsets = [0, 1], sizes = [8, 1], strides = [1, 1]} : vector<8x2xi32> to vector<8x1xi32>
    %12 = tpu.iota {dimensions = array<i32: 1>} : vector<8x16xi32>
    %13 = vector.broadcast %11 : vector<8x1xi32> to vector<8x16xi32>
    %14 = arith.cmpi eq, %13, %12 : vector<8x16xi32>
    %15 = arith.extui %14 : vector<8x16xi1> to vector<8x16xi32>
    %16 = arith.sitofp %15 : vector<8x16xi32> to vector<8x16xf32>
    %c16 = arith.constant 16 : index
    %c0_4 = arith.constant 0 : index
    %17 = vector.load %arg3[%c16, %c0_4] : memref<32x128xf32, #tpu.memory_space<vmem>>, vector<16x128xf32>
    %cst_5 = arith.constant dense<0.000000e+00> : vector<8x128xf32>
    %18 = tpu.matmul %16, %17, %cst_5 {dimension_numbers = #tpu.dot_dimension_numbers<[1], [0], [0], [1], [0, 0, 1, 1], [], []>, precision = #tpu.contract_precision<fp32>} : vector<8x16xf32>, vector<16x128xf32>, vector<8x128xf32> -> vector<8x128xf32>
    %19 = arith.addf %10, %18 : vector<8x128xf32>
    %c0_6 = arith.constant 0 : index
    %c0_7 = arith.constant 0 : index
    %20 = vector.load %arg2[%c0_6, %c0_7] : memref<8x1xf32, #tpu.memory_space<vmem>>, vector<8x1xf32>
    %21 = vector.broadcast %20 : vector<8x1xf32> to vector<8x128xf32>
    %22 = arith.mulf %19, %21 : vector<8x128xf32>
    %c0_8 = arith.constant 0 : index
    %c0_9 = arith.constant 0 : index
    %23 = vector.load %arg4[%c0_8, %c0_9] : memref<8x128xf32, #tpu.memory_space<vmem>>, vector<8x128xf32>
    tpu.vector_store %arg4[%c0_8, %c0_9], %22 {strides = array<i32>} : memref<8x128xf32, #tpu.memory_space<vmem>>, vector<8x128xf32>,
    return
  }
  func.func @transform_0(%arg0: i32) -> (i32, i32) {
    %c0_i32 = arith.constant 0 : i32
    %c0_i32_0 = arith.constant 0 : i32
    return %arg0, %c0_i32 : i32, i32
  }
  func.func @transform_1(%arg0: i32) -> (i32, i32) {
    %c0_i32 = arith.constant 0 : i32
    %c0_i32_0 = arith.constant 0 : i32
    return %arg0, %c0_i32 : i32, i32
  }
  func.func @transform_2(%arg0: i32) -> (i32, i32) {
    %c0_i32 = arith.constant 0 : i32
    %c0_i32_0 = arith.constant 0 : i32
    %c0_i32_1 = arith.constant 0 : i32
    return %c0_i32, %c0_i32_0 : i32, i32
  }
  func.func @transform_3(%arg0: i32) -> (i32, i32) {
    %c0_i32 = arith.constant 0 : i32
    %c0_i32_0 = arith.constant 0 : i32
    return %arg0, %c0_i32 : i32, i32
  }
}

</mosaic_0001>

<bundles_post_ra>
// kernel: tpu_custom_call.1
= control target key start
LH: loop header
LB: loop body
LE: loop exit
PB: predicated region body
PF: predicated region fallthrough
CT: control target
= control target key end

     0   :  { %8 = vsyncpa [#allocation3], 0  ;;  %s888_s0 = inlined_call_operand.vmem [shape: s32[16,2], index: 0, kind: input, shape index: {}]   ;;  %s889_s1 = inlined_call_operand.vmem [shape: f32[16,1], index: 1, kind: input, shape index: {}]   ;;  %s890_s2 = inlined_call_operand.vmem [shape: f32[32,128], index: 2, kind: input, shape index: {}]   ;;  %s891_s3 = inlined_call_operand.hbm [shape: f32[16,128], index: 3, kind: output, shape index: {}]  }
   0x1   :  { %10 = vsyncpa [#allocation3 + $0x1], 0  ;;  %s773_s12 = smov 0   ;;  %s775_s13 = smov 0  }
   0x2   :  { %s777_s14 = smov 0   ;;  %s779_s15 = smov 0  }
   0x3 LB: > { %s794_s16 = sadd.s32 4294967295, %s748_s15   ;;  %s622_s17 = sadd.s32 4294967294, %s748_s15   ;;  %s748_s15 = sphi %s779_s15, %s897_s15   ;;  %s744_s14 = sphi %s777_s14, %s896_s14   ;;  %s740_s13 = sphi %s775_s13, %s895_s13   ;;  %s736_s12 = sphi %s773_s12, %s894_s12  }
   0x4   : > { %s798_s18 = sadd.s32 1, %s748_s15   ;;  %s96_s19 = sadd.s32 1, %s744_s14 }
   0x5   : > { %s93_s20 = ssub.s32 %s748_s15, %s798_s18  ;;  %p106_p0 = scmp.ne.s32.totalorder %s744_s14, %s740_s13 }
   0x6   : > { %p94_p1 = scmp.eq.s32.totalorder %s93_s20, 0  ;;  %p107_p2 = scmp.eq.s32.totalorder %s794_s16, 1 }
   0x7   : > { %p112_p3 = scmp.ne.s32.totalorder %s740_s13, %s736_s12  ;;  %p113_p4 = scmp.eq.s32.totalorder %s622_s17, 1 }
   0x8   : > { %s809_s21 = scalar_select %p94_p1, %s744_s14, %s96_s19  }
   0x9   : > { %p811_p5 = por %p107_p2, %p106_p0  ;;  %p815_p6 = por %p113_p4, %p112_p3 }
   0xa   : > { %p625_p7 = scmp.ge.s32.totalorder %s748_s15, 1  ;;  %p148_p8 = scmp.lt.s32.totalorder %s748_s15, 3 }
   0xc   : > { %p149_p9 = pnand %p625_p7, %p148_p8 }
   0xd   : > { %p175_p10 = scmp.lt.s32.totalorder (!%p149_p9), %s794_s16, 1  ;;  %s172_s19 = sand.u32 (!%p149_p9), 1, %s740_s13  }
   0xe   : > { %152 = sbr.rel (%p149_p9) target bundleno = 308 (0x134), region = 32  ;;  %s626_s20 = sshll.u32 (!%p149_p9), %s172_s19, 3 }
   0xf   : > { %s638_s24 = sshll.u32 (!%p149_p9), %s794_s16, 3  ;;  %s174_s28 = scalar_lea.vmem (!%p149_p9), [#allocation2], %s626_s20 }
  0x10   : > { %s548_s29 = sshll.u32 (!%p149_p9), %s174_s28, 4  ;;  %s706_s8 = scalar_lea.hbm (!%p149_p9), %s891_s3, 16  ;;  %s549_s29 = int_to_ptr.vmem [resolvable:$true] %s548_s29 }
  0x13   : > { %v201_v0 = vld [vmem:[%s890_s2 + $0x18] sm:$0xff]  ;;  %v750_v1 = vmov 1   ;;  %v751_v3 = vmov 0   ;;  %s826_s26 = scalar_select %p175_p10, %s794_s16, 1  ;;  %v200_v9 = vld [vmem:[%s890_s2 + $0x10] sm:$0xff]  ;;  %v193_v15 = vld [vmem:[%s890_s2 + $0x8] sm:$0xff]  ;;  %v184_v27 = vlaneseq }
  0x14   : > { %683 = vset.pattern.permute.xlu0 %v750_v1  ;;  %v220_v2 = vand.u32 4294901760, %v201_v0  ;;  %685 = vset.pattern.permute.xlu1 %v751_v3  ;;  %v222_v10 = vand.u32 4294901760, %v200_v9  ;;  %v382_v16 = vand.u32 4294901760, %v193_v15  ;;  %v192_v17 = vld [vmem:[%s890_s2] sm:$0xff]  ;;  %vm202_vm0 = vcmask 130048   ;;  %s536_s16 = scalar_lea.sflag [#allocation3], %s172_s19 }
  0x15   : > { %s627_s27 = sshll.u32 %s826_s26, 3  ;;  %v384_v19 = vand.u32 4294901760, %v192_v17  ;;  %v185_v28 = vand.u32 127, %v184_v27  ;;  %v752_v31 = vmov 0.0  }
  0x16   : > { %v248_v4 = vsub.f32 %v201_v0, %v220_v2  ;;  %305 = vmatpush.msra.mxu3 %v220_v2  ;;  %221 = vmatpush.msra.mxu0 %v220_v2  ;;  %s178_s30 = scalar_lea.vmem %s888_s0, %s627_s27  ;;  %v254_v11 = vsub.f32 %v200_v9, %v222_v10  ;;  %v410_v18 = vsub.f32 %v193_v15, %v382_v16  ;;  %s182_s17 = scalar_lea.vmem %s889_s1, %s627_s27 }
  0x17   : > { %v183_v6 = vld [vmem:[%s178_s30] sm:$0xff]  ;;  %v416_v21 = vsub.f32 %v192_v17, %v384_v19  ;;  %s546_s27 = scalar_lea.hbm %s891_s3, %s638_s24 }
  0x18   : > { %v249_v5 = vand.u32 4294901760, %v248_v4  ;;  %280 = vmatpush.msra.mxu2 %v248_v4  ;;  %195 = vperm.xlu0 %683, %v183_v6   ;;  %v255_v12 = vand.u32 4294901760, %v254_v11  ;;  %v411_v20 = vand.u32 4294901760, %v410_v18  ;;  %v527_v29 = vld [vmem:[%s182_s17] sm:$0xff]  ;;  %s550_s30 = sshll.u32 %s546_s27, 4  ;;  %s551_s30 = int_to_ptr.hbm [resolvable:$true] %s550_s30 }
  0x19   : > { %307 = vmatpush.msra.mxu3 %v222_v10  ;;  %223 = vmatpush.msra.mxu0 %v222_v10  ;;  %v417_v23 = vand.u32 4294901760, %v416_v21  ;;  %s700_s4 = sshra.s32 %s551_s30, 4  ;;  %s701_s4 = int_to_ptr.hbm [resolvable:$true] %s700_s4 }
  0x1a   : > { %v250_v7 = vsub.f32 %v248_v4, %v249_v5  ;;  %283 = vmatpush.msra.mxu2 %v254_v11  ;;  %v256_v13 = vsub.f32 %v254_v11, %v255_v12  ;;  %v412_v22 = vsub.f32 %v410_v18, %v411_v20  ;;  %530 = vperm.xlu1 %685, %v527_v29   ;;  %s702_s5 = scalar_lea.hbm %s701_s4, 8  ;;  %p707_p0 = scmp.lt.s32.totalorder %s701_s4, %s891_s3 }
  0x1b   : > { %332 = vmatpush.msrb.mxu0 %v249_v5  ;;  %v418_v25 = vsub.f32 %v416_v21, %v417_v23  ;;  %p703_p11 = scmp.ne.s32.totalorder %s701_s4, %s702_s5  ;;  %p708_p1 = scmp.lt.s32.totalorder %s706_s8, %s702_s5 }
  0x1c   : > { %v251_v8 = vand.u32 4294901760, %v250_v7  ;;  %v257_v14 = vand.u32 4294901760, %v256_v13  ;;  %383 = vmatpush.msrb.mxu2 %v382_v16  ;;  %v413_v24 = vand.u32 4294901760, %v412_v22 }
  0x1d   : > { %336 = vmatpush.msrb.mxu0 %v255_v12  ;;  %v419_v26 = vand.u32 4294901760, %v418_v25  ;;  %p704_p12 = pnand %p703_p11, %p811_p5  ;;  %p709_p2 = por %p708_p1, %p707_p0 }
  0x1e   : > { %252 = vmatpush.msra.mxu1 %v251_v8  ;;  %385 = vmatpush.msrb.mxu2 %v384_v19 }
  0x1f   : > { %414 = vmatpush.msrb.mxu3 %v413_v24  ;;  %p705_p13 = pneg %p704_p12 }
  0x20   : > { %684 = vset.pattern.permute.xlu0 %v751_v3  ;;  %258 = vmatpush.msra.mxu1 %v257_v14 }
  0x21   : > { %187 = vperm.xlu0 %684, %v183_v6   ;;  %420 = vmatpush.msrb.mxu3 %v419_v26  ;;  %p710_p3 = pnand %p709_p2, %p705_p13 }
  0x22   : > { %357 = vmatpush.msrb.mxu1 %v220_v2 }
  0x24   : > { %359 = vmatpush.msrb.mxu1 %v222_v10 }
  0x8a   : > { %v196_v30 = vpop.permute.xlu0 %195 }
  0x8b   : > { %vm197_vm1 = vcmp.eq.s32.totalorder %v196_v30, %v185_v28 }
  0x8c   : > { %v630_v32 = vsel %vm197_vm1, 1.0, %v752_v31  ;;  %v531_v3 = vpop.permute.xlu1 %530 }
  0x8d   : > { %631 = vmatmul.msk.f32.vlgmr.msra.gmra.mxu1 %vm202_vm0, %v630_v32  ;;  %v204_v33 = vsel %vm202_vm0, %v630_v32, 0 }
  0x8e   : > { %v225_v34 = vsub.f32 %v204_v33, %v204_v33  ;;  %467 = vmatpush.msra.mxu1 %v382_v16 }
  0x90   : > { %286 = vmatmul.f32.vlgmr.msra.gmra.mxu2 %v225_v34  ;;  %v226_v35 = vand.u32 4294901760, %v225_v34  ;;  %469 = vmatpush.msra.mxu1 %v384_v19 }
  0x91   : > { %494 = vmatpush.msra.mxu2 %v411_v20 }
  0x92   : > { %311 = vmatmul.f32.vlgmr.msra.gmra.mxu3 %v226_v35  ;;  %v227_v36 = vsub.f32 %v225_v34, %v226_v35 }
  0x93   : > { %v188_v37 = vpop.permute.xlu0 %187  ;;  %519 = vmatpush.msra.mxu3 %v382_v16  ;;  %498 = vmatpush.msra.mxu2 %v417_v23 }
  0x94   : > { %vm189_vm2 = vcmp.eq.s32.totalorder %v188_v37, %v185_v28  ;;  %v228_v38 = vand.u32 4294901760, %v227_v36 }
  0x95   : > { %v629_v39 = vsel %vm189_vm2, 1.0, %v752_v31  ;;  %633 = vmatmul.msk.f32.vlgmr.msrb.gmra.mxu1 %vm202_vm0, %v630_v32  ;;  %521 = vmatpush.msra.mxu3 %v384_v19 }
  0x96   : > { %v366_v40 = vsel %vm202_vm0, %v629_v39, 0  ;;  %229 = vmatmul.f32.vlgmr.msra.gmra.mxu0 %v228_v38 }
  0x97   : > { %v387_v41 = vsub.f32 %v366_v40, %v366_v40  ;;  %442 = vmatpush.msra.mxu0 %v410_v18 }
  0x99   : > { %v388_v42 = vand.u32 4294901760, %v387_v41  ;;  %445 = vmatpush.msra.mxu0 %v416_v21 }
  0x9a   : > { %634 = vmatmul.msk.f32.vlgmr.msrb.gmra.mxu3 %vm202_vm0, %v629_v39 }
  0x9b   : > { %v389_v43 = vsub.f32 %v387_v41, %v388_v42 }
  0x9d   : > { %473 = vmatmul.f32.vlgmr.msra.gmra.mxu1 %v388_v42  ;;  %v390_v44 = vand.u32 4294901760, %v389_v43 }
  0x9e   : > { %632 = vmatmul.msk.f32.vlgmr.msrb.gmra.mxu0 %vm202_vm0, %v630_v32 }
  0x9f   : > { %391 = vmatmul.f32.vlgmr.msrb.gmra.mxu2 %v390_v44 }
  0xa2   : > { %636 = vmatmul.msk.f32.vlgmr.msra.gmra.mxu3 %vm202_vm0, %v629_v39 }
  0xa6   : > { %448 = vmatmul.f32.vlgmr.msra.gmra.mxu0 %v387_v41 }
  0xa7   : > { %635 = vmatmul.msk.f32.vlgmr.msra.gmra.mxu2 %vm202_vm0, %v629_v39 }
 0x10a   : > { %v261_v45 = vpop.f32.mrf.mxu1 }
 0x112   : > { %v362_v54 = vpop.f32.mrf.mxu1 }
 0x113   : > { %v230_v46 = vpop.f32.mrf.mxu0  ;;  %v287_v48 = vpop.f32.mrf.mxu2 }
 0x114   : > { %v262_v47 = vadd.f32 %v261_v45, %v230_v46 }
 0x115   : > { %v312_v50 = vpop.f32.mrf.mxu3 }
 0x116   : > { %v288_v49 = vadd.f32 %v287_v48, %v262_v47 }
 0x118   : > { %v313_v51 = vadd.f32 %v312_v50, %v288_v49 }
 0x11a   : > { %v474_v62 = vpop.f32.mrf.mxu1 }
 0x11b   : > { %v339_v52 = vpop.f32.mrf.mxu0 }
 0x11c   : > { %v340_v53 = vadd.f32 %v339_v52, %v313_v51 }
 0x11d   : > { %v423_v56 = vpop.f32.mrf.mxu3 }
 0x11e   : > { %v363_v55 = vadd.f32 %v362_v54, %v340_v53 }
 0x122   : > { %v392_v57 = vpop.f32.mrf.mxu2 }
 0x123   : > { %v393_v58 = vadd.f32 %v392_v57, %v363_v55  ;;  %v449_v60 = vpop.f32.mrf.mxu0 }
 0x125   : > { %v424_v59 = vadd.f32 %v423_v56, %v393_v58  ;;  %v524_v2 = vpop.f32.mrf.mxu3 }
 0x127   : > { %v450_v61 = vadd.f32 %v449_v60, %v424_v59 }
 0x129   : > { %v475_v63 = vadd.f32 %v474_v62, %v450_v61 }
 0x12a   : > { %v501_v0 = vpop.f32.mrf.mxu2 }
 0x12b   : > { %v502_v1 = vadd.f32 %v501_v0, %v475_v63 }
 0x12d   : > { %v525_v4 = vadd.f32 %v524_v2, %v502_v1 }
 0x12f   : > { %v533_v5 = vmul.f32 %v531_v3, %v525_v4 }
 0x131   : > { %534 = vst [vmem:[%s174_s28] sm:$0xff] %v533_v5 }
 0x132   : > { %713 = shalt.err (!%p710_p3)
}
 0x133   : > { %641 = dma.vmem_to_hbm [thread:$0]  (%p811_p5), %s549_s29, 128, %s551_s30, %s536_s16  }
 0x134 PF: > { %p647_p4 = scmp.ge.s32.totalorder %s748_s15, 2  ;;  %s562_s11 = sand.u32 1, %s736_s12  }
 0x135   : > { %s563_s17 = scalar_lea.sflag [#allocation3], %s562_s11 }
 0x136   : > { %p644_p7 = pnand %p647_p4, %p815_p6 }
 0x138   : > { %p645_p8 = pneg %p644_p7 }
 0x13a   : > { %731 = dma.done.wait (%p645_p8), %s563_s17, 128  }
 0x13b   : > { %733 = vsyncadd (%p645_p8), %s563_s17, 4294967168  ;;  %p13_p9 = scmp.ge.s32.totalorder %s798_s18, 4   ;;  %s894_s12 = smov %s740_s13 }
 0x13c   : > { %s895_s13 = smov %s744_s14  ;;  %s896_s14 = smov %s809_s21 }
 0x13d   : > { %s897_s15 = smov %s798_s18  ;;  %15 = sbr.rel (!%p13_p9) target bundleno = 3 (0x3), region = 70 }
 0x142   :  { %569 = vsyncpa [#allocation3], 1 }
 0x143   :  { %571 = vsyncpa [#allocation3 + $0x1], 1 }

</bundles_post_ra>
